<compile_context>
chip_gen: v5e
topology: v5e:2x2
jax: 0.10.0
libtpu: 0.0.40
codegen_flags: <defaults>
</compile_context>

<pallas_src>
import functools

import jax
import jax.numpy as jnp
from jax.experimental import pallas as pl
from jax.experimental.pallas import tpu as pltpu


def _round_up(x, m):
  return ((x + m - 1) // m) * m


# --------------------------------------------------------------------------
# Model-load-time constant folding (review: hoist constant prep out of the
# per-call path; fold the Linear into the knowledge tables).
# --------------------------------------------------------------------------
def fold_knowledge_params(common_table, demo_table, rep_table,
                          fc_weight, fc_bias, alpha, beta):
  """Returns (p_table (V,E), w_sum (E,E)) so that the forward pass is
  out = word_emb @ w_sum + p_table[texts]."""
  V, E = common_table.shape
  w1t = fc_weight[:, :E].T.astype(jnp.float32)          # (E, E), acts on demo branch
  w2t = fc_weight[:, E:].T.astype(jnp.float32)          # (E, E), acts on rep branch
  wsum_t = w1t + w2t
  p_table = ((beta * (1.0 - alpha)) * (common_table.astype(jnp.float32) @ wsum_t)
             + (1.0 - beta) * (demo_table.astype(jnp.float32) @ w1t
                               + rep_table.astype(jnp.float32) @ w2t)
             + fc_bias.reshape(1, E).astype(jnp.float32))
  w_sum = (alpha * beta) * wsum_t
  return p_table.astype(jnp.float32), w_sum.astype(jnp.float32)


# --------------------------------------------------------------------------
# Kernel: one row tile of  out = we @ Wsum + P_rows
# --------------------------------------------------------------------------
def _fused_kernel(we_ref, p_ref, w_ref, o_ref, *, matmul_dtype):
  """we_ref: (TM,E)  p_ref: (TM,E)  w_ref: (E,E)  o_ref: (TM,E)."""
  we = we_ref[...]
  if matmul_dtype is not None:
    we = we.astype(matmul_dtype)          # operands-only downcast; f32 accumulate
  acc = jnp.dot(we, w_ref[...], preferred_element_type=jnp.float32)
  o_ref[...] = (acc + p_ref[...]).astype(o_ref.dtype)


# --------------------------------------------------------------------------
# Tile sizing / VMEM budgeting
# --------------------------------------------------------------------------
def _vmem_budget_bytes():
  try:
    cap = int(pltpu.get_tpu_info().vmem_capacity_bytes)
  except Exception:
    cap = 64 * 1024 * 1024                # conservative (v7x physical size)
  return int(0.75 * cap)                  # leave headroom for compiler scratch


def _pick_row_tile(n_rows, embed, budget_bytes):
  # Per-E defaults from the review (amortize ~0.35us/step pipeline overhead).
  if embed <= 128:
    tm = 2048
  elif embed <= 256:
    tm = 1024
  else:
    tm = 1024
  # Clamp so double-buffered (we, p, out) streams + resident Wsum fit budget.
  stream_bytes_per_row = 3 * 2 * embed * 4
  resident = 2 * embed * embed * 4 + (2 << 20)
  max_rows = max(8, (budget_bytes - resident) // stream_bytes_per_row)
  tm = min(tm, (int(max_rows) // 8) * 8)
  tm = max(8, tm)
  tm = min(tm, _round_up(n_rows, 8))
  return tm


def _is_v5e():
  try:
    kind = jax.devices()[0].device_kind.lower()
  except Exception:
    return False
  return ("v5 lite" in kind) or ("v5e" in kind) or ("v5litepod" in kind)


# --------------------------------------------------------------------------
# Forward
# --------------------------------------------------------------------------
def knowledge_encoding_forward(word_embeddings, texts, p_table, w_sum,
                               *, row_tile=None, matmul_dtype=None):
  """Pallas implementation of KnowledgeEncoding.forward (inference mode).

  word_embeddings: (B, S, E) float32
  texts:           (B, S) int32 vocab indices
  p_table:         (V, E) folded knowledge+bias table (fold_knowledge_params)
  w_sum:           (E, E) folded word-embedding weight (fold_knowledge_params)
  """
  B, S, E = word_embeddings.shape
  N = B * S

  we = word_embeddings.reshape(N, E)
  # Single XLA gather of the folded (V,E) table (3x smaller than the old
  # (V,3E) gather; no per-call table concat).
  p = jnp.take(p_table, texts.reshape(-1), axis=0)          # (N, E)
  w = w_sum if matmul_dtype is None else w_sum.astype(matmul_dtype)

  budget = _vmem_budget_bytes()
  tm = _pick_row_tile(N, E, budget) if row_tile is None else int(row_tile)
  tm = max(8, (tm // 8) * 8)
  tm = min(tm, _round_up(N, 8))

  # Ragged last tile instead of jnp.pad copies: Pallas clips OOB reads/writes
  # of the boundary block, and those rows never reach HBM.
  grid = (pl.cdiv(N, tm),)

  vmem_need = (3 * 2 * tm * E * 4                       # double-buffered streams
               + 2 * E * E * jnp.dtype(w.dtype).itemsize  # resident Wsum
               + (2 << 20))                             # slack
  vmem_limit = int(min(budget, max(vmem_need, 16 * 1024 * 1024)))

  kernel = functools.partial(_fused_kernel, matmul_dtype=matmul_dtype)

  out_flat = pl.pallas_call(
      kernel,
      out_shape=jax.ShapeDtypeStruct((N, E), word_embeddings.dtype),
      grid_spec=pltpu.PrefetchScalarGridSpec(
          num_scalar_prefetch=0,
          grid=grid,
          in_specs=[
              pl.BlockSpec((tm, E), lambda i: (i, 0)),      # word-emb rows
              pl.BlockSpec((tm, E), lambda i: (i, 0)),      # folded knowledge rows
              pl.BlockSpec((E, E), lambda i: (0, 0)),       # resident Wsum
          ],
          out_specs=pl.BlockSpec((tm, E), lambda i: (i, 0)),
      ),
      compiler_params=pltpu.CompilerParams(
          dimension_semantics=("parallel",),
          vmem_limit_bytes=vmem_limit),
  )(we, p, w)

  # TODO(synk): nn.Dropout(p=0.3) is a no-op in eval mode; training-mode
  # stochastic dropout is not applied here.
  return out_flat.reshape(B, S, E)


# --------------------------------------------------------------------------
# Pure-JAX reference (mirrors the PyTorch forward exactly)
# --------------------------------------------------------------------------
def _reference_forward(word_embeddings, texts, common_table, demo_table,
                       rep_table, fc_weight, fc_bias, alpha, beta):
  ck = jnp.take(common_table, texts, axis=0)
  dk = jnp.take(demo_table, texts, axis=0)
  rk = jnp.take(rep_table, texts, axis=0)
  c = word_embeddings * alpha + ck * (1 - alpha)
  d = c * beta + dk * (1 - beta)
  r = c * beta + rk * (1 - beta)
  cat = jnp.concatenate([d, r], axis=2)
  return cat @ fc_weight.T + fc_bias


if __name__ == "__main__":
  # Small deterministic setup consistent with the module:
  # embed_size must be 128/256/512 -> use 128; batch=2, seq=8, vocab=32.
  B, S, E, V = 2, 8, 128, 32
  alpha, beta = 0.7, 0.6

  key = jax.random.PRNGKey(0)
  k_we, k_tx, k_c, k_d, k_r, k_w = jax.random.split(key, 6)

  word_embeddings = jax.random.normal(k_we, (B, S, E), dtype=jnp.float32)
  texts = jax.random.randint(k_tx, (B, S), 0, V, dtype=jnp.int32)

  # Knowledge tables: deterministic stand-ins for the pre-trained .npy files,
  # with row 0 zeroed (module maps vocab index 0 to a zero vector).
  def make_table(k):
    t = jax.random.normal(k, (V, E), dtype=jnp.float32)
    return t.at[0].set(0.0)

  common_table = make_table(k_c)
  demo_table = make_table(k_d)
  rep_table = make_table(k_r)

  # fuse_knowledge_fc: weight ~ U(-0.5, 0.5), bias zero (init_weights()).
  fc_weight = jax.random.uniform(k_w, (E, 2 * E), dtype=jnp.float32,
                                 minval=-0.5, maxval=0.5)
  fc_bias = jnp.zeros((E,), dtype=jnp.float32)

  # ---- model-load-time fold (done once, not per forward call) -------------
  p_table, w_sum = fold_knowledge_params(
      common_table, demo_table, rep_table, fc_weight, fc_bias, alpha, beta)

  # v5e: feed bf16 operands to the MXU (f32 accumulation kept); keep exact
  # f32 numerics on v6e/v7x.
  matmul_dtype = jnp.bfloat16 if _is_v5e() else None

  fwd = jax.jit(functools.partial(knowledge_encoding_forward,
                                  matmul_dtype=matmul_dtype))
  out = fwd(word_embeddings, texts, p_table, w_sum)
  out = jax.block_until_ready(out)

  ref = _reference_forward(
      word_embeddings, texts, common_table, demo_table, rep_table,
      fc_weight, fc_bias, alpha, beta)
  assert out.shape == (B, S, E)
  if matmul_dtype is None:
    atol, rtol = 2e-3, 2e-3
  else:  # bf16 MXU operands on v5e: looser tolerance, numerics-visible change
    atol, rtol = 8e-2, 3e-2
  assert jnp.allclose(out, ref, atol=atol, rtol=rtol), \
      float(jnp.max(jnp.abs(out - ref)))

  print("KERNEL_OK")
</pallas_src>

<mosaic_0001>
module attributes {stable_mosaic.version = 11 : i64} {
  func.func @_fused_kernel(%arg0: i32, %arg1: memref<16x128xf32, #tpu.memory_space<vmem>>, %arg2: memref<16x128xf32, #tpu.memory_space<vmem>>, %arg3: memref<128x128xf32, #tpu.memory_space<vmem>>, %arg4: memref<16x128xf32, #tpu.memory_space<vmem>>) attributes {dimension_semantics = [#tpu.dimension_semantics<parallel>], iteration_bounds = array<i64: 1>, scalar_prefetch = 0 : i64, scratch_operands = 0 : i64, tpu.core_type = #tpu.core_type<tc>, window_params = [{transform_indices = @transform_0, window_bounds = array<i64: 16, 128>}, {transform_indices = @transform_1, window_bounds = array<i64: 16, 128>}, {pipeline_mode = #tpu.pipeline_mode<synchronous>, transform_indices = @transform_2, window_bounds = array<i64: 128, 128>}, {transform_indices = @transform_3, window_bounds = array<i64: 16, 128>}]} {
    %c0 = arith.constant 0 : index
    %c0_0 = arith.constant 0 : index
    %0 = vector.load %arg1[%c0, %c0_0] : memref<16x128xf32, #tpu.memory_space<vmem>>, vector<16x128xf32>
    %c0_1 = arith.constant 0 : index
    %c0_2 = arith.constant 0 : index
    %1 = vector.load %arg3[%c0_1, %c0_2] : memref<128x128xf32, #tpu.memory_space<vmem>>, vector<128x128xf32>
    %cst = arith.constant dense<0.000000e+00> : vector<16x128xf32>
    %2 = tpu.matmul %0, %1, %cst {dimension_numbers = #tpu.dot_dimension_numbers<[1], [0], [0], [1], [0, 0, 1, 1], [], []>} : vector<16x128xf32>, vector<128x128xf32>, vector<16x128xf32> -> vector<16x128xf32>
    %c0_3 = arith.constant 0 : index
    %c0_4 = arith.constant 0 : index
    %3 = vector.load %arg2[%c0_3, %c0_4] : memref<16x128xf32, #tpu.memory_space<vmem>>, vector<16x128xf32>
    %4 = arith.addf %2, %3 : vector<16x128xf32>
    %c0_5 = arith.constant 0 : index
    %c0_6 = arith.constant 0 : index
    %5 = vector.load %arg4[%c0_5, %c0_6] : memref<16x128xf32, #tpu.memory_space<vmem>>, vector<16x128xf32>
    tpu.vector_store %arg4[%c0_5, %c0_6], %4 {strides = array<i32>} : memref<16x128xf32, #tpu.memory_space<vmem>>, vector<16x128xf32>,
    return
  }
  func.func @transform_0(%arg0: i32) -> (i32, i32) {
    %c0_i32 = arith.constant 0 : i32
    %c0_i32_0 = arith.constant 0 : i32
    return %arg0, %c0_i32 : i32, i32
  }
  func.func @transform_1(%arg0: i32) -> (i32, i32) {
    %c0_i32 = arith.constant 0 : i32
    %c0_i32_0 = arith.constant 0 : i32
    return %arg0, %c0_i32 : i32, i32
  }
  func.func @transform_2(%arg0: i32) -> (i32, i32) {
    %c0_i32 = arith.constant 0 : i32
    %c0_i32_0 = arith.constant 0 : i32
    %c0_i32_1 = arith.constant 0 : i32
    return %c0_i32, %c0_i32_0 : i32, i32
  }
  func.func @transform_3(%arg0: i32) -> (i32, i32) {
    %c0_i32 = arith.constant 0 : i32
    %c0_i32_0 = arith.constant 0 : i32
    return %arg0, %c0_i32 : i32, i32
  }
}

</mosaic_0001>

<bundles_post_ra>
// kernel: knowledge_encoding_forward.1
= control target key start
LH: loop header
LB: loop body
LE: loop exit
PB: predicated region body
PF: predicated region fallthrough
CT: control target
= control target key end

     0   :  { %s209_s0 = inlined_call_operand.vmem [shape: f32[16,128], index: 0, kind: input, shape index: {}]   ;;  %s210_s1 = inlined_call_operand.vmem [shape: f32[16,128], index: 1, kind: input, shape index: {}]   ;;  %s211_s2 = inlined_call_operand.vmem [shape: f32[128,128], index: 2, kind: input, shape index: {}]   ;;  %s212_s3 = inlined_call_operand.hbm [shape: f32[16,128], index: 3, kind: output, shape index: {}]  }
   0x1   :  { %v32_v0 = vld [vmem:[%s211_s2 + $0x78] sm:$0xff]  ;;  %v31_v1 = vld [vmem:[%s211_s2 + $0x70] sm:$0xff]  ;;  %v30_v2 = vld [vmem:[%s211_s2 + $0x68] sm:$0xff] }
   0x2   :  { %35 = vmatpush.msra.mxu0 %v32_v0  ;;  %78 = vmatpush.msra.mxu1 %v32_v0  ;;  %v29_v3 = vld [vmem:[%s211_s2 + $0x60] sm:$0xff]  ;;  %v28_v4 = vld [vmem:[%s211_s2 + $0x58] sm:$0xff] }
   0x4   :  { %36 = vmatpush.msra.mxu0 %v31_v1  ;;  %79 = vmatpush.msra.mxu1 %v31_v1 }
   0x6   :  { %37 = vmatpush.msra.mxu0 %v30_v2  ;;  %80 = vmatpush.msra.mxu1 %v30_v2 }
   0x7   :  { %8 = vsyncpa [#allocation3], 0  ;;  %v27_v5 = vld [vmem:[%s211_s2 + $0x50] sm:$0xff]  ;;  %v26_v6 = vld [vmem:[%s211_s2 + $0x48] sm:$0xff]  ;;  %s123_s24 = smov [#allocation2]   ;;  %s66_s28 = sshll.u32 %s212_s3, 4  ;;  %s67_s28 = int_to_ptr.hbm [resolvable:$true] %s66_s28 }
   0x8   :  { %38 = vmatpush.msra.mxu0 %v29_v3  ;;  %81 = vmatpush.msra.mxu1 %v29_v3  ;;  %v25_v7 = vld [vmem:[%s211_s2 + $0x40] sm:$0xff]  ;;  %v24_v8 = vld [vmem:[%s211_s2 + $0x38] sm:$0xff]  ;;  %v23_v9 = vld [vmem:[%s211_s2 + $0x30] sm:$0xff]  ;;  %s64_s25 = sshll.u32 %s123_s24, 4  ;;  %s125_s29 = smov 8   ;;  %s65_s25 = int_to_ptr.vmem [resolvable:$true] %s64_s25 }
   0x9   :  { %v22_v10 = vld [vmem:[%s211_s2 + $0x28] sm:$0xff]  ;;  %v21_v11 = vld [vmem:[%s211_s2 + $0x20] sm:$0xff]  ;;  %v20_v12 = vld [vmem:[%s211_s2 + $0x18] sm:$0xff] }
   0xa   :  { %39 = vmatpush.msra.mxu0 %v28_v4  ;;  %82 = vmatpush.msra.mxu1 %v28_v4  ;;  %v19_v13 = vld [vmem:[%s211_s2 + $0x10] sm:$0xff]  ;;  %v18_v14 = vld [vmem:[%s211_s2 + $0x8] sm:$0xff]  ;;  %v17_v15 = vld [vmem:[%s211_s2] sm:$0xff] }
   0xb   :  { %v15_v16 = vld [vmem:[%s209_s0] sm:$0xff]  ;;  %v16_v17 = vld [vmem:[%s209_s0 + $0x8] sm:$0xff]  ;;  %s124_s0 = smov 128  }
   0xc   :  { %40 = vmatpush.msra.mxu0 %v27_v5  ;;  %83 = vmatpush.msra.mxu1 %v27_v5  ;;  %v33_v18 = vld [vmem:[%s210_s1] sm:$0xff]  ;;  %v34_v19 = vld [vmem:[%s210_s1 + $0x8] sm:$0xff] }
   0xe   :  { %41 = vmatpush.msra.mxu0 %v26_v6  ;;  %84 = vmatpush.msra.mxu1 %v26_v6 }
  0x10   :  { %42 = vmatpush.msra.mxu0 %v25_v7  ;;  %85 = vmatpush.msra.mxu1 %v25_v7 }
  0x12   :  { %43 = vmatpush.msra.mxu0 %v24_v8  ;;  %86 = vmatpush.msra.mxu1 %v24_v8 }
  0x14   :  { %44 = vmatpush.msra.mxu0 %v23_v9  ;;  %87 = vmatpush.msra.mxu1 %v23_v9 }
  0x16   :  { %45 = vmatpush.msra.mxu0 %v22_v10  ;;  %88 = vmatpush.msra.mxu1 %v22_v10 }
  0x18   :  { %46 = vmatpush.msra.mxu0 %v21_v11  ;;  %89 = vmatpush.msra.mxu1 %v21_v11 }
  0x1a   :  { %47 = vmatpush.msra.mxu0 %v20_v12  ;;  %90 = vmatpush.msra.mxu1 %v20_v12 }
  0x1c   :  { %48 = vmatpush.msra.mxu0 %v19_v13  ;;  %91 = vmatpush.msra.mxu1 %v19_v13 }
  0x1e   :  { %49 = vmatpush.msra.mxu0 %v18_v14  ;;  %92 = vmatpush.msra.mxu1 %v18_v14 }
  0x20   :  { %50 = vmatpush.msra.mxu0 %v17_v15  ;;  %93 = vmatpush.msra.mxu1 %v17_v15 }
  0x21   :  { %51 = vmatmul.f32.vlgmr.msra.gmra.mxu0 %v15_v16  ;;  %54 = vmatmul.f32.vlgmr.msra.gmra.mxu1 %v16_v17 }
  0x9e   :  { %v52_v20 = vpop.f32.mrf.mxu0  ;;  %v55_v21 = vpop.f32.mrf.mxu1 }
  0x9f   :  { %v53_v22 = vadd.f32 %v52_v20, %v33_v18  ;;  %v56_v23 = vadd.f32 %v55_v21, %v34_v19 }
  0xa1   :  { %58 = vst [vmem:[#allocation2] sm:$0xff] %v53_v22 }
  0xa2   :  { %59 = vst [vmem:[#allocation2 + $0x8] sm:$0xff] %v56_v23 }
  0xa3   :  { %72 = dma.vmem_to_hbm [thread:$0]  %s65_s25, 256, %s67_s28, [#allocation3], %s124_s0, %s124_s0, %s125_s29  }
  0xa4   :  { %121 = dma.done.wait [#allocation3], 256  }
  0xa5   :  { %122 = vsyncadd [#allocation3], 4294967040 }
  0xa6   :  { %77 = vsyncpa [#allocation3], 1 }

</bundles_post_ra>
